<compile_context>
chip_gen: v6e
topology: v6e:2x2x1
jax: 0.10.0
libtpu: 0.0.40
codegen_flags: <defaults>
</compile_context>

<pallas_src>
import jax
import jax.numpy as jnp
from jax.experimental import pallas as pl
from jax.experimental.pallas import tpu as pltpu

_EPS = 1e-8
_LANES = 128
_BLOCK_ROWS = 2048  # (2048, 128) f32 = 1 MiB per block buffer


def _threshold_kernel(x_ref, o_ref):
    # eval / no-noise training:  (sigmoid(x/temp) >= 0.5) == (x >= 0)
    o_ref[...] = (x_ref[...] >= 0).astype(o_ref.dtype)


def _noise_threshold_kernel(x_ref, n_ref, o_ref):
    # training with gumbel noise: sigmoid((x+n)/temp) >= 0.5  <=>  x + n >= 0
    x = x_ref[...].astype(jnp.float32)
    o_ref[...] = (x + n_ref[...] >= 0.0).astype(o_ref.dtype)


def gumbel_diff_noise(key, shape, eps=_EPS):
    """g1 - g2 with g_i = -log(-log(U_i + eps) + eps), matching the PyTorch module."""
    k1, k2 = jax.random.split(key)
    u1 = jax.random.uniform(k1, shape, dtype=jnp.float32)
    u2 = jax.random.uniform(k2, shape, dtype=jnp.float32)
    g1 = -jnp.log(-jnp.log(u1 + eps) + eps)
    g2 = -jnp.log(-jnp.log(u2 + eps) + eps)
    return g1 - g2


def _to_lane_major(a):
    """Flatten to a lane-dense (rows, 128) view.  Returns (a2d, numel, pad)."""
    flat = a.reshape(-1)
    n = flat.shape[0]
    pad = (-n) % _LANES
    if pad:  # rare ragged-tail case only
        flat = jnp.concatenate([flat, jnp.zeros((pad,), flat.dtype)])
    return flat.reshape(-1, _LANES), n, pad


def gumbel_softmax(x, *, key=None, seed=0, gumbel_temp=1.0, gumbel_noise=True,
                   training=True, out_dtype=jnp.float32):
    if not gumbel_temp > 0:
        raise ValueError("gumbel_temp must be > 0")
    # gumbel_temp only rescales sigmoid's argument; it cannot move the result
    # across 0.5, so the forward VALUE is temp-independent (used by gradient only).
    # TODO(synk): straight-through (detach-trick) gradient is not implemented;
    #             this is the forward value only (no custom_vjp).
    # TODO(synk): torch.isnan assert has no clean in-kernel equivalent; the
    #             output is {0, 1} by construction (NaN inputs threshold to 0).

    orig_shape = x.shape
    x2d, n, pad = _to_lane_major(x)
    m = x2d.shape[0]

    block_rows = min(_BLOCK_ROWS, m)          # full-array block for small inputs
    grid = (pl.cdiv(m, block_rows),)          # partial last block handled by Pallas
    blk = pl.BlockSpec((block_rows, _LANES), lambda i: (i, 0))
    out_shape = jax.ShapeDtypeStruct(x2d.shape, out_dtype)

    params = {}
    if jax.default_backend() == "tpu":
        params = dict(compiler_params=pltpu.CompilerParams(
            dimension_semantics=("parallel",)))

    if training and gumbel_noise:
        if key is None:
            key = jax.random.PRNGKey(seed)
        noise = gumbel_diff_noise(key, orig_shape)     # exact PyTorch formula
        n2d, _, _ = _to_lane_major(noise)
        out2d = pl.pallas_call(
            _noise_threshold_kernel,
            out_shape=out_shape,
            grid=grid,
            in_specs=[blk, blk],
            out_specs=blk,
            **params,
        )(x2d, n2d)
    else:
        out2d = pl.pallas_call(
            _threshold_kernel,
            out_shape=out_shape,
            grid=grid,
            in_specs=[blk],
            out_specs=blk,
            **params,
        )(x2d)

    out = out2d.reshape(-1)
    if pad:
        out = out[:n]
    return out.reshape(orig_shape)


if __name__ == "__main__":
    root = jax.random.PRNGKey(0)
    k_x, k_noise = jax.random.split(root)
    # NCHW, matching the PyTorch convention
    x = jax.random.normal(k_x, (2, 4, 16, 16), dtype=jnp.float32)

    # training path with gumbel noise (deterministic noise key -> exact reference)
    y_train = jax.block_until_ready(
        gumbel_softmax(x, key=k_noise, gumbel_temp=1.0,
                       gumbel_noise=True, training=True))

    # training path without noise -> (sigmoid(x) >= 0.5) == (x >= 0)
    y_nonoise = jax.block_until_ready(
        gumbel_softmax(x, gumbel_noise=False, training=True))

    # eval path: (x >= 0).float()
    y_eval = jax.block_until_ready(gumbel_softmax(x, training=False))

    ref_eval = (x >= 0).astype(jnp.float32)
    ref_train = ((x + gumbel_diff_noise(k_noise, x.shape)) >= 0).astype(jnp.float32)

    assert y_train.shape == x.shape and y_train.dtype == jnp.float32
    assert bool(jnp.all((y_train == 0.0) | (y_train == 1.0)))
    assert bool(jnp.all(y_eval == ref_eval))
    assert bool(jnp.all(y_nonoise == ref_eval))
    # exact reference check for the noisy training path (same key, same formula)
    assert bool(jnp.all(y_train == ref_train))

    print("KERNEL_OK")
</pallas_src>

<mosaic_0001>
module attributes {stable_mosaic.version = 11 : i64} {
  func.func @_noise_threshold_kernel(%arg0: i32, %arg1: memref<16x128xf32, #tpu.memory_space<vmem>>, %arg2: memref<16x128xf32, #tpu.memory_space<vmem>>, %arg3: memref<16x128xf32, #tpu.memory_space<vmem>>) attributes {dimension_semantics = [#tpu.dimension_semantics<arbitrary>], iteration_bounds = array<i64: 1>, scalar_prefetch = 0 : i64, scratch_operands = 0 : i64, tpu.core_type = #tpu.core_type<tc>, window_params = [{transform_indices = @transform_0, window_bounds = array<i64: 16, 128>}, {transform_indices = @transform_1, window_bounds = array<i64: 16, 128>}, {transform_indices = @transform_2, window_bounds = array<i64: 16, 128>}]} {
    %c0 = arith.constant 0 : index
    %c0_0 = arith.constant 0 : index
    %0 = vector.load %arg1[%c0, %c0_0] : memref<16x128xf32, #tpu.memory_space<vmem>>, vector<16x128xf32>
    %c0_1 = arith.constant 0 : index
    %c0_2 = arith.constant 0 : index
    %1 = vector.load %arg2[%c0_1, %c0_2] : memref<16x128xf32, #tpu.memory_space<vmem>>, vector<16x128xf32>
    %2 = arith.addf %0, %1 : vector<16x128xf32>
    %cst = arith.constant 0.000000e+00 : f32
    %3 = vector.broadcast %cst : f32 to vector<16x128xf32>
    %4 = arith.cmpf oge, %2, %3 : vector<16x128xf32>
    %5 = arith.extui %4 : vector<16x128xi1> to vector<16x128xi32>
    %6 = arith.sitofp %5 : vector<16x128xi32> to vector<16x128xf32>
    %c0_3 = arith.constant 0 : index
    %c0_4 = arith.constant 0 : index
    %7 = vector.load %arg3[%c0_3, %c0_4] : memref<16x128xf32, #tpu.memory_space<vmem>>, vector<16x128xf32>
    tpu.vector_store %arg3[%c0_3, %c0_4], %6 {strides = array<i32>} : memref<16x128xf32, #tpu.memory_space<vmem>>, vector<16x128xf32>,
    return
  }
  func.func @transform_0(%arg0: i32) -> (i32, i32) {
    %c0_i32 = arith.constant 0 : i32
    %c0_i32_0 = arith.constant 0 : i32
    return %arg0, %c0_i32 : i32, i32
  }
  func.func @transform_1(%arg0: i32) -> (i32, i32) {
    %c0_i32 = arith.constant 0 : i32
    %c0_i32_0 = arith.constant 0 : i32
    return %arg0, %c0_i32 : i32, i32
  }
  func.func @transform_2(%arg0: i32) -> (i32, i32) {
    %c0_i32 = arith.constant 0 : i32
    %c0_i32_0 = arith.constant 0 : i32
    return %arg0, %c0_i32 : i32, i32
  }
}

</mosaic_0001>

<bundles_post_ra>
// kernel: tpu_custom_call.1
= control target key start
LH: loop header
LB: loop body
LE: loop exit
PB: predicated region body
PF: predicated region fallthrough
CT: control target
= control target key end

     0   :  { %7 = vsyncpa [#allocation3], 0  ;;  %s185_s0 = inlined_call_operand.hbm [shape: f32[16,128], index: 0, kind: input, shape index: {}]   ;;  %s186_s1 = inlined_call_operand.hbm [shape: f32[16,128], index: 1, kind: input, shape index: {}]   ;;  %s187_s2 = inlined_call_operand.hbm [shape: f32[16,128], index: 2, kind: output, shape index: {}]  }
   0x1   :  { %8 = vsyncpa [#allocation6], 0 }
   0x2   :  { %9 = vsyncpa [#allocation4], 0  ;;  %s146_s9 = smov [#allocation2]  }
   0x3   :  { %s15_s10 = sshll.u32 %s146_s9, 4  ;;  %s16_s10 = int_to_ptr.vmem [resolvable:$true] %s15_s10 }
   0x4   :  { %s88_s11 = scalar_lea.vmem %s16_s10, 256  ;;  %p93_p1 = scmp.lt.s32.totalorder %s16_s10, %s16_s10 }
   0x5   :  { %p89_p0 = scmp.ne.s32.totalorder %s16_s10, %s88_s11  ;;  %p94_p2 = scmp.lt.s32.totalorder %s88_s11, %s88_s11 }
   0x7   :  { %p95_p3 = por %p94_p2, %p93_p1 }
   0x9   :  { %p96_p4 = pnand %p95_p3, %p89_p0 }
   0xb   :  { %99 = shalt.err (!%p96_p4)
}
   0xc   :  { %s147_s12 = smov 128   ;;  %s148_s13 = smov 8  }
   0xd   :  { %21 = dma.hbm_to_vmem [thread:$0]  %s185_s0, 256, %s16_s10, [#allocation3], %s147_s12, %s147_s12, %s148_s13  }
   0xe   :  { %s149_s16 = smov [#allocation5]  }
   0xf   :  { %s27_s17 = sshll.u32 %s149_s16, 4  ;;  %s28_s17 = int_to_ptr.vmem [resolvable:$true] %s27_s17 }
  0x10   :  { %s108_s18 = scalar_lea.vmem %s28_s17, 256  ;;  %p113_p6 = scmp.lt.s32.totalorder %s28_s17, %s28_s17 }
  0x11   :  { %p109_p5 = scmp.ne.s32.totalorder %s28_s17, %s108_s18  ;;  %p114_p7 = scmp.lt.s32.totalorder %s108_s18, %s108_s18 }
  0x13   :  { %p115_p8 = por %p114_p7, %p113_p6 }
  0x15   :  { %p116_p9 = pnand %p115_p8, %p109_p5 }
  0x17   :  { %119 = shalt.err (!%p116_p9)
}
  0x18   :  { %33 = dma.hbm_to_vmem [thread:$0]  %s186_s1, 256, %s28_s17, [#allocation6], %s147_s12, %s147_s12, %s148_s13  }
  0x19   :  { %140 = dma.done.wait [#allocation3], 256  }
  0x1a   :  { %141 = vsyncadd [#allocation3], 4294967040 }
  0x1b   :  { %142 = dma.done.wait [#allocation6], 256  }
  0x1c   :  { %143 = vsyncadd [#allocation6], 4294967040  ;;  %v40_v0 = vld [vmem:[#allocation2] sm:$0xff]  ;;  %v42_v1 = vld [vmem:[#allocation5] sm:$0xff]  ;;  %s150_s0 = smov [#allocation7]   ;;  %v151_v6 = vmov 0.0  }
  0x1d   :  { %v41_v2 = vld [vmem:[#allocation2 + $0x8] sm:$0xff]  ;;  %v44_v3 = vadd.f32 %v42_v1, %v40_v0  ;;  %v43_v4 = vld [vmem:[#allocation5 + $0x8] sm:$0xff]  ;;  %s59_s21 = sshll.u32 %s150_s0, 4  ;;  %s60_s21 = int_to_ptr.vmem [resolvable:$true] %s59_s21 }
  0x1e   :  { %v45_v5 = vadd.f32 %v43_v4, %v41_v2  ;;  %s120_s1 = scalar_lea.vmem %s60_s21, 256  ;;  %p125_p11 = scmp.lt.s32.totalorder %s60_s21, %s60_s21 }
  0x1f   :  { %vm46_vm0 = vcmp.ge.f32.partialorder %v44_v3, 0.0  ;;  %p121_p10 = scmp.ne.s32.totalorder %s60_s21, %s120_s1  ;;  %p126_p12 = scmp.lt.s32.totalorder %s120_s1, %s120_s1 }
  0x20   :  { %v72_v7 = vsel %vm46_vm0, 1.0, %v151_v6  ;;  %vm47_vm1 = vcmp.ge.f32.partialorder %v45_v5, 0.0 }
  0x21   :  { %52 = vst [vmem:[#allocation7] sm:$0xff] %v72_v7  ;;  %v73_v8 = vsel %vm47_vm1, 1.0, %v151_v6  ;;  %p127_p13 = por %p126_p12, %p125_p11 }
  0x22   :  { %53 = vst [vmem:[#allocation7 + $0x8] sm:$0xff] %v73_v8 }
  0x23   :  { %p128_p0 = pnand %p127_p13, %p121_p10 }
  0x25   :  { %131 = shalt.err (!%p128_p0)
}
  0x26   :  { %65 = dma.vmem_to_hbm [thread:$0]  %s60_s21, 256, %s187_s2, [#allocation4], %s147_s12, %s147_s12, %s148_s13  }
  0x27   :  { %144 = dma.done.wait [#allocation4], 256  }
  0x28   :  { %145 = vsyncadd [#allocation4], 4294967040 }
  0x29   :  { %69 = vsyncpa [#allocation3], 1 }
  0x2a   :  { %70 = vsyncpa [#allocation6], 1 }
  0x2b   :  { %71 = vsyncpa [#allocation4], 1 }

</bundles_post_ra>
